<compile_context>
chip_gen: v7x
topology: tpu7x:2x2x1
jax: 0.10.0
libtpu: 0.0.40
codegen_flags: <defaults>
</compile_context>

<pallas_src>
import functools

import numpy as np
import jax
import jax.numpy as jnp
from jax.experimental import pallas as pl
from jax.experimental.pallas import tpu as pltpu


def _fused_dwsep_kernel(x_ref, wm_ref, pw_ref, b_ref, out_ref, *,
                        K, pad, S, HW, W):
    """Fused depthwise (KxKxK, groups=C) + pointwise (1x1x1) conv, all batches.

    x_ref:   (R, S)       VMEM, R = N*C rows, S = D*H*W lane-dense spatial
    wm_ref:  (K^3, R, S)  VMEM, per-tap fused (halo mask * depthwise weight)
    pw_ref:  (Ro, R)      VMEM, block-diagonal pointwise weight (Ro = N*Cout)
    b_ref:   (Ro, 1)      VMEM, fused bias (pw_w @ dw_b + pw_b, tiled over N)
    out_ref: (Ro, S)      VMEM
    """
    x = x_ref[...]                      # (R, S) f32, full 8-sublane vregs
    acc = jnp.zeros_like(x)

    # ---- depthwise: XLU lane-roll per tap + one VPU multiply-accumulate ----
    t = 0
    for kd in range(K):
        dd = kd - pad
        for kh in range(K):
            dh = kh - pad
            for kw in range(K):
                dw_ = kw - pad
                off = dd * HW + dh * W + dw_
                # Circular lane rotation; wrapped / halo lanes are zeroed by
                # the precomputed mask folded into wm_ref[t].
                x_sh = x if off == 0 else pltpu.roll(x, shift=(-off) % S, axis=1)
                acc = acc + x_sh * wm_ref[t]
                t += 1

    # ---- pointwise 1x1x1 conv == block-diagonal channel matmul (MXU) ----
    out = jnp.dot(pw_ref[...], acc, preferred_element_type=jnp.float32)
    out_ref[...] = (out + b_ref[...]).astype(out_ref.dtype)


def _tap_masks(D, H, W, K, pad):
    """(K^3, S) f32 validity mask per tap / flat spatial position (trace-time)."""
    d = np.repeat(np.arange(D), H * W)
    h = np.tile(np.repeat(np.arange(H), W), D)
    w = np.tile(np.arange(W), D * H)
    masks = []
    for kd in range(K):
        dd = kd - pad
        for kh in range(K):
            dh = kh - pad
            for kw in range(K):
                dw_ = kw - pad
                m = ((d + dd >= 0) & (d + dd < D)
                     & (h + dh >= 0) & (h + dh < H)
                     & (w + dw_ >= 0) & (w + dw_ < W))
                masks.append(m)
    return np.stack(masks).astype(np.float32)


@functools.partial(jax.jit, static_argnames=("padding",))
def depthwise_separable_conv3d(x, dw_w, dw_b, pw_w, pw_b, *, padding):
    """x: (N, C, D, H, W); dw_w: (C, K, K, K); dw_b: (C,);
    pw_w: (Cout, C); pw_b: (Cout,). Returns (N, Cout, D, H, W)."""
    N, C, D, H, W = x.shape
    K = dw_w.shape[-1]
    Cout = pw_w.shape[0]
    S = D * H * W
    K3 = K * K * K
    R_in = N * C
    R_out = N * Cout

    assert 2 * padding == K - 1, "kernel assumes 'same' spatial output (stride 1)"
    assert padding < min(D, H, W), "roll+mask scheme requires pad < min(D, H, W)"

    # Contiguous reshape: batch folded into the sublane (row) axis. Free.
    x_flat = x.reshape(R_in, S)

    # Trace-time halo masks fused with depthwise weights, tiled over batch:
    # wm[t, n*C + c, s] = mask[t, s] * dw_w[c, tap t].
    masks = jnp.asarray(_tap_masks(D, H, W, K, padding))    # (K3, S) const
    w_taps = jnp.tile(dw_w.reshape(C, K3).T, (1, N))         # (K3, N*C)
    wm = w_taps[:, :, None] * masks[:, None, :]               # (K3, N*C, S)

    # Block-diagonal pointwise weight and fused (depthwise+pointwise) bias.
    pw_bd = jnp.kron(jnp.eye(N, dtype=pw_w.dtype), pw_w)      # (N*Cout, N*C)
    fused_b = pw_w @ dw_b + pw_b                               # (Cout,)
    b_packed = jnp.tile(fused_b, N).reshape(R_out, 1)          # (N*Cout, 1)

    flops = 2 * R_in * S * K3 + 2 * R_out * R_in * S
    bytes_accessed = 4 * (x_flat.size + wm.size + pw_bd.size
                          + b_packed.size + R_out * S)

    out_flat = pl.pallas_call(
        functools.partial(_fused_dwsep_kernel,
                          K=K, pad=padding, S=S, HW=H * W, W=W),
        out_shape=jax.ShapeDtypeStruct((R_out, S), jnp.float32),
        grid=(1,),
        in_specs=[
            pl.BlockSpec((R_in, S), lambda i: (0, 0)),
            pl.BlockSpec((K3, R_in, S), lambda i: (0, 0, 0)),
            pl.BlockSpec((R_out, R_in), lambda i: (0, 0)),
            pl.BlockSpec((R_out, 1), lambda i: (0, 0)),
        ],
        out_specs=pl.BlockSpec((R_out, S), lambda i: (0, 0)),
        cost_estimate=pl.CostEstimate(flops=flops, transcendentals=0,
                                      bytes_accessed=bytes_accessed),
    )(x_flat, wm, pw_bd, b_packed)

    return out_flat.reshape(N, Cout, D, H, W)


def _reference(x, dw_w, dw_b, pw_w, pw_b, *, padding):
    """Pure-JAX reference (lax conv) matching PyTorch Conv3d semantics."""
    N, C, D, H, W = x.shape
    Cout = pw_w.shape[0]
    dw = jax.lax.conv_general_dilated(
        x, dw_w[:, None],  # (C, 1, K, K, K)
        window_strides=(1, 1, 1),
        padding=[(padding, padding)] * 3,
        dimension_numbers=("NCDHW", "OIDHW", "NCDHW"),
        feature_group_count=C)
    dw = dw + dw_b[None, :, None, None, None]
    out = jax.lax.conv_general_dilated(
        dw, pw_w.reshape(Cout, C, 1, 1, 1),
        window_strides=(1, 1, 1),
        padding="VALID",
        dimension_numbers=("NCDHW", "OIDHW", "NCDHW"))
    return out + pw_b[None, :, None, None, None]


if __name__ == "__main__":
    # Small shapes consistent with the module: nin=4, nout=8, kernel_size=3, padding=1.
    N, C, Cout = 2, 4, 8
    D = H = W = 8
    K, padding = 3, 1

    key = jax.random.PRNGKey(0)
    k1, k2, k3, k4, k5 = jax.random.split(key, 5)
    # Deterministic synthetic parameters (shapes follow nn.Conv3d in __init__).
    dw_w = jax.random.normal(k1, (C, K, K, K), jnp.float32) * 0.1  # depthwise (C*kpl, 1, K, K, K) squeezed
    dw_b = jax.random.normal(k2, (C,), jnp.float32) * 0.1
    pw_w = jax.random.normal(k3, (Cout, C), jnp.float32) * 0.1     # pointwise (Cout, C, 1, 1, 1) squeezed
    pw_b = jax.random.normal(k4, (Cout,), jnp.float32) * 0.1
    x = jax.random.normal(k5, (N, C, D, H, W), jnp.float32)

    out = depthwise_separable_conv3d(x, dw_w, dw_b, pw_w, pw_b, padding=padding)
    out = jax.block_until_ready(out)

    ref = _reference(x, dw_w, dw_b, pw_w, pw_b, padding=padding)
    assert out.shape == (N, Cout, D, H, W)
    assert jnp.allclose(out, ref, atol=1e-4, rtol=1e-4), "mismatch vs reference"

    print("KERNEL_OK")
</pallas_src>

<mosaic_0001>
module attributes {stable_mosaic.version = 11 : i64} {
  func.func @_fused_dwsep_kernel(%arg0: i32, %arg1: memref<8x512xf32, #tpu.memory_space<vmem>>, %arg2: memref<27x8x512xf32, #tpu.memory_space<vmem>>, %arg3: memref<16x8xf32, #tpu.memory_space<vmem>>, %arg4: memref<16x1xf32, #tpu.memory_space<vmem>>, %arg5: memref<16x512xf32, #tpu.memory_space<vmem>>) attributes {dimension_semantics = [#tpu.dimension_semantics<arbitrary>], iteration_bounds = array<i64: 1>, scalar_prefetch = 0 : i64, scratch_operands = 0 : i64, tpu.core_type = #tpu.core_type<tc>, window_params = [{pipeline_mode = #tpu.pipeline_mode<synchronous>, transform_indices = @transform_0, window_bounds = array<i64: 8, 512>}, {pipeline_mode = #tpu.pipeline_mode<synchronous>, transform_indices = @transform_1, window_bounds = array<i64: 27, 8, 512>}, {pipeline_mode = #tpu.pipeline_mode<synchronous>, transform_indices = @transform_2, window_bounds = array<i64: 16, 8>}, {pipeline_mode = #tpu.pipeline_mode<synchronous>, transform_indices = @transform_3, window_bounds = array<i64: 16, 1>}, {pipeline_mode = #tpu.pipeline_mode<synchronous>, transform_indices = @transform_4, window_bounds = array<i64: 16, 512>}]} {
    %c0 = arith.constant 0 : index
    %c0_0 = arith.constant 0 : index
    %0 = vector.load %arg1[%c0, %c0_0] : memref<8x512xf32, #tpu.memory_space<vmem>>, vector<8x512xf32>
    %cst = arith.constant 0.000000e+00 : f32
    %1 = vector.broadcast %cst : f32 to vector<8x512xf32>
    %c73_i32 = arith.constant 73 : i32
    %2 = tpu.dynamic_rotate %0 by %c73_i32 dim 1 : vector<8x512xf32>, i32 -> vector<8x512xf32>
    %c0_1 = arith.constant 0 : index
    %c0_2 = arith.constant 0 : index
    %c0_3 = arith.constant 0 : index
    %3 = vector.load %arg2[%c0_1, %c0_2, %c0_3] : memref<27x8x512xf32, #tpu.memory_space<vmem>>, vector<1x8x512xf32>
    %4 = vector.shape_cast %3 : vector<1x8x512xf32> to vector<8x512xf32>
    %5 = arith.mulf %2, %4 : vector<8x512xf32>
    %6 = arith.addf %1, %5 : vector<8x512xf32>
    %c72_i32 = arith.constant 72 : i32
    %7 = tpu.dynamic_rotate %0 by %c72_i32 dim 1 : vector<8x512xf32>, i32 -> vector<8x512xf32>
    %c1 = arith.constant 1 : index
    %c0_4 = arith.constant 0 : index
    %c0_5 = arith.constant 0 : index
    %8 = vector.load %arg2[%c1, %c0_4, %c0_5] : memref<27x8x512xf32, #tpu.memory_space<vmem>>, vector<1x8x512xf32>
    %9 = vector.shape_cast %8 : vector<1x8x512xf32> to vector<8x512xf32>
    %10 = arith.mulf %7, %9 : vector<8x512xf32>
    %11 = arith.addf %6, %10 : vector<8x512xf32>
    %c71_i32 = arith.constant 71 : i32
    %12 = tpu.dynamic_rotate %0 by %c71_i32 dim 1 : vector<8x512xf32>, i32 -> vector<8x512xf32>
    %c2 = arith.constant 2 : index
    %c0_6 = arith.constant 0 : index
    %c0_7 = arith.constant 0 : index
    %13 = vector.load %arg2[%c2, %c0_6, %c0_7] : memref<27x8x512xf32, #tpu.memory_space<vmem>>, vector<1x8x512xf32>
    %14 = vector.shape_cast %13 : vector<1x8x512xf32> to vector<8x512xf32>
    %15 = arith.mulf %12, %14 : vector<8x512xf32>
    %16 = arith.addf %11, %15 : vector<8x512xf32>
    %c65_i32 = arith.constant 65 : i32
    %17 = tpu.dynamic_rotate %0 by %c65_i32 dim 1 : vector<8x512xf32>, i32 -> vector<8x512xf32>
    %c3 = arith.constant 3 : index
    %c0_8 = arith.constant 0 : index
    %c0_9 = arith.constant 0 : index
    %18 = vector.load %arg2[%c3, %c0_8, %c0_9] : memref<27x8x512xf32, #tpu.memory_space<vmem>>, vector<1x8x512xf32>
    %19 = vector.shape_cast %18 : vector<1x8x512xf32> to vector<8x512xf32>
    %20 = arith.mulf %17, %19 : vector<8x512xf32>
    %21 = arith.addf %16, %20 : vector<8x512xf32>
    %c64_i32 = arith.constant 64 : i32
    %22 = tpu.dynamic_rotate %0 by %c64_i32 dim 1 : vector<8x512xf32>, i32 -> vector<8x512xf32>
    %c4 = arith.constant 4 : index
    %c0_10 = arith.constant 0 : index
    %c0_11 = arith.constant 0 : index
    %23 = vector.load %arg2[%c4, %c0_10, %c0_11] : memref<27x8x512xf32, #tpu.memory_space<vmem>>, vector<1x8x512xf32>
    %24 = vector.shape_cast %23 : vector<1x8x512xf32> to vector<8x512xf32>
    %25 = arith.mulf %22, %24 : vector<8x512xf32>
    %26 = arith.addf %21, %25 : vector<8x512xf32>
    %c63_i32 = arith.constant 63 : i32
    %27 = tpu.dynamic_rotate %0 by %c63_i32 dim 1 : vector<8x512xf32>, i32 -> vector<8x512xf32>
    %c5 = arith.constant 5 : index
    %c0_12 = arith.constant 0 : index
    %c0_13 = arith.constant 0 : index
    %28 = vector.load %arg2[%c5, %c0_12, %c0_13] : memref<27x8x512xf32, #tpu.memory_space<vmem>>, vector<1x8x512xf32>
    %29 = vector.shape_cast %28 : vector<1x8x512xf32> to vector<8x512xf32>
    %30 = arith.mulf %27, %29 : vector<8x512xf32>
    %31 = arith.addf %26, %30 : vector<8x512xf32>
    %c57_i32 = arith.constant 57 : i32
    %32 = tpu.dynamic_rotate %0 by %c57_i32 dim 1 : vector<8x512xf32>, i32 -> vector<8x512xf32>
    %c6 = arith.constant 6 : index
    %c0_14 = arith.constant 0 : index
    %c0_15 = arith.constant 0 : index
    %33 = vector.load %arg2[%c6, %c0_14, %c0_15] : memref<27x8x512xf32, #tpu.memory_space<vmem>>, vector<1x8x512xf32>
    %34 = vector.shape_cast %33 : vector<1x8x512xf32> to vector<8x512xf32>
    %35 = arith.mulf %32, %34 : vector<8x512xf32>
    %36 = arith.addf %31, %35 : vector<8x512xf32>
    %c56_i32 = arith.constant 56 : i32
    %37 = tpu.dynamic_rotate %0 by %c56_i32 dim 1 : vector<8x512xf32>, i32 -> vector<8x512xf32>
    %c7 = arith.constant 7 : index
    %c0_16 = arith.constant 0 : index
    %c0_17 = arith.constant 0 : index
    %38 = vector.load %arg2[%c7, %c0_16, %c0_17] : memref<27x8x512xf32, #tpu.memory_space<vmem>>, vector<1x8x512xf32>
    %39 = vector.shape_cast %38 : vector<1x8x512xf32> to vector<8x512xf32>
    %40 = arith.mulf %37, %39 : vector<8x512xf32>
    %41 = arith.addf %36, %40 : vector<8x512xf32>
    %c55_i32 = arith.constant 55 : i32
    %42 = tpu.dynamic_rotate %0 by %c55_i32 dim 1 : vector<8x512xf32>, i32 -> vector<8x512xf32>
    %c8 = arith.constant 8 : index
    %c0_18 = arith.constant 0 : index
    %c0_19 = arith.constant 0 : index
    %43 = vector.load %arg2[%c8, %c0_18, %c0_19] : memref<27x8x512xf32, #tpu.memory_space<vmem>>, vector<1x8x512xf32>
    %44 = vector.shape_cast %43 : vector<1x8x512xf32> to vector<8x512xf32>
    %45 = arith.mulf %42, %44 : vector<8x512xf32>
    %46 = arith.addf %41, %45 : vector<8x512xf32>
    %c9_i32 = arith.constant 9 : i32
    %47 = tpu.dynamic_rotate %0 by %c9_i32 dim 1 : vector<8x512xf32>, i32 -> vector<8x512xf32>
    %c9 = arith.constant 9 : index
    %c0_20 = arith.constant 0 : index
    %c0_21 = arith.constant 0 : index
    %48 = vector.load %arg2[%c9, %c0_20, %c0_21] : memref<27x8x512xf32, #tpu.memory_space<vmem>>, vector<1x8x512xf32>
    %49 = vector.shape_cast %48 : vector<1x8x512xf32> to vector<8x512xf32>
    %50 = arith.mulf %47, %49 : vector<8x512xf32>
    %51 = arith.addf %46, %50 : vector<8x512xf32>
    %c8_i32 = arith.constant 8 : i32
    %52 = tpu.dynamic_rotate %0 by %c8_i32 dim 1 : vector<8x512xf32>, i32 -> vector<8x512xf32>
    %c10 = arith.constant 10 : index
    %c0_22 = arith.constant 0 : index
    %c0_23 = arith.constant 0 : index
    %53 = vector.load %arg2[%c10, %c0_22, %c0_23] : memref<27x8x512xf32, #tpu.memory_space<vmem>>, vector<1x8x512xf32>
    %54 = vector.shape_cast %53 : vector<1x8x512xf32> to vector<8x512xf32>
    %55 = arith.mulf %52, %54 : vector<8x512xf32>
    %56 = arith.addf %51, %55 : vector<8x512xf32>
    %c7_i32 = arith.constant 7 : i32
    %57 = tpu.dynamic_rotate %0 by %c7_i32 dim 1 : vector<8x512xf32>, i32 -> vector<8x512xf32>
    %c11 = arith.constant 11 : index
    %c0_24 = arith.constant 0 : index
    %c0_25 = arith.constant 0 : index
    %58 = vector.load %arg2[%c11, %c0_24, %c0_25] : memref<27x8x512xf32, #tpu.memory_space<vmem>>, vector<1x8x512xf32>
    %59 = vector.shape_cast %58 : vector<1x8x512xf32> to vector<8x512xf32>
    %60 = arith.mulf %57, %59 : vector<8x512xf32>
    %61 = arith.addf %56, %60 : vector<8x512xf32>
    %c1_i32 = arith.constant 1 : i32
    %62 = tpu.dynamic_rotate %0 by %c1_i32 dim 1 : vector<8x512xf32>, i32 -> vector<8x512xf32>
    %c12 = arith.constant 12 : index
    %c0_26 = arith.constant 0 : index
    %c0_27 = arith.constant 0 : index
    %63 = vector.load %arg2[%c12, %c0_26, %c0_27] : memref<27x8x512xf32, #tpu.memory_space<vmem>>, vector<1x8x512xf32>
    %64 = vector.shape_cast %63 : vector<1x8x512xf32> to vector<8x512xf32>
    %65 = arith.mulf %62, %64 : vector<8x512xf32>
    %66 = arith.addf %61, %65 : vector<8x512xf32>
    %c13 = arith.constant 13 : index
    %c0_28 = arith.constant 0 : index
    %c0_29 = arith.constant 0 : index
    %67 = vector.load %arg2[%c13, %c0_28, %c0_29] : memref<27x8x512xf32, #tpu.memory_space<vmem>>, vector<1x8x512xf32>
    %68 = vector.shape_cast %67 : vector<1x8x512xf32> to vector<8x512xf32>
    %69 = arith.mulf %0, %68 : vector<8x512xf32>
    %70 = arith.addf %66, %69 : vector<8x512xf32>
    %c511_i32 = arith.constant 511 : i32
    %71 = tpu.dynamic_rotate %0 by %c511_i32 dim 1 : vector<8x512xf32>, i32 -> vector<8x512xf32>
    %c14 = arith.constant 14 : index
    %c0_30 = arith.constant 0 : index
    %c0_31 = arith.constant 0 : index
    %72 = vector.load %arg2[%c14, %c0_30, %c0_31] : memref<27x8x512xf32, #tpu.memory_space<vmem>>, vector<1x8x512xf32>
    %73 = vector.shape_cast %72 : vector<1x8x512xf32> to vector<8x512xf32>
    %74 = arith.mulf %71, %73 : vector<8x512xf32>
    %75 = arith.addf %70, %74 : vector<8x512xf32>
    %c505_i32 = arith.constant 505 : i32
    %76 = tpu.dynamic_rotate %0 by %c505_i32 dim 1 : vector<8x512xf32>, i32 -> vector<8x512xf32>
    %c15 = arith.constant 15 : index
    %c0_32 = arith.constant 0 : index
    %c0_33 = arith.constant 0 : index
    %77 = vector.load %arg2[%c15, %c0_32, %c0_33] : memref<27x8x512xf32, #tpu.memory_space<vmem>>, vector<1x8x512xf32>
    %78 = vector.shape_cast %77 : vector<1x8x512xf32> to vector<8x512xf32>
    %79 = arith.mulf %76, %78 : vector<8x512xf32>
    %80 = arith.addf %75, %79 : vector<8x512xf32>
    %c504_i32 = arith.constant 504 : i32
    %81 = tpu.dynamic_rotate %0 by %c504_i32 dim 1 : vector<8x512xf32>, i32 -> vector<8x512xf32>
    %c16 = arith.constant 16 : index
    %c0_34 = arith.constant 0 : index
    %c0_35 = arith.constant 0 : index
    %82 = vector.load %arg2[%c16, %c0_34, %c0_35] : memref<27x8x512xf32, #tpu.memory_space<vmem>>, vector<1x8x512xf32>
    %83 = vector.shape_cast %82 : vector<1x8x512xf32> to vector<8x512xf32>
    %84 = arith.mulf %81, %83 : vector<8x512xf32>
    %85 = arith.addf %80, %84 : vector<8x512xf32>
    %c503_i32 = arith.constant 503 : i32
    %86 = tpu.dynamic_rotate %0 by %c503_i32 dim 1 : vector<8x512xf32>, i32 -> vector<8x512xf32>
    %c17 = arith.constant 17 : index
    %c0_36 = arith.constant 0 : index
    %c0_37 = arith.constant 0 : index
    %87 = vector.load %arg2[%c17, %c0_36, %c0_37] : memref<27x8x512xf32, #tpu.memory_space<vmem>>, vector<1x8x512xf32>
    %88 = vector.shape_cast %87 : vector<1x8x512xf32> to vector<8x512xf32>
    %89 = arith.mulf %86, %88 : vector<8x512xf32>
    %90 = arith.addf %85, %89 : vector<8x512xf32>
    %c457_i32 = arith.constant 457 : i32
    %91 = tpu.dynamic_rotate %0 by %c457_i32 dim 1 : vector<8x512xf32>, i32 -> vector<8x512xf32>
    %c18 = arith.constant 18 : index
    %c0_38 = arith.constant 0 : index
    %c0_39 = arith.constant 0 : index
    %92 = vector.load %arg2[%c18, %c0_38, %c0_39] : memref<27x8x512xf32, #tpu.memory_space<vmem>>, vector<1x8x512xf32>
    %93 = vector.shape_cast %92 : vector<1x8x512xf32> to vector<8x512xf32>
    %94 = arith.mulf %91, %93 : vector<8x512xf32>
    %95 = arith.addf %90, %94 : vector<8x512xf32>
    %c456_i32 = arith.constant 456 : i32
    %96 = tpu.dynamic_rotate %0 by %c456_i32 dim 1 : vector<8x512xf32>, i32 -> vector<8x512xf32>
    %c19 = arith.constant 19 : index
    %c0_40 = arith.constant 0 : index
    %c0_41 = arith.constant 0 : index
    %97 = vector.load %arg2[%c19, %c0_40, %c0_41] : memref<27x8x512xf32, #tpu.memory_space<vmem>>, vector<1x8x512xf32>
    %98 = vector.shape_cast %97 : vector<1x8x512xf32> to vector<8x512xf32>
    %99 = arith.mulf %96, %98 : vector<8x512xf32>
    %100 = arith.addf %95, %99 : vector<8x512xf32>
    %c455_i32 = arith.constant 455 : i32
    %101 = tpu.dynamic_rotate %0 by %c455_i32 dim 1 : vector<8x512xf32>, i32 -> vector<8x512xf32>
    %c20 = arith.constant 20 : index
    %c0_42 = arith.constant 0 : index
    %c0_43 = arith.constant 0 : index
    %102 = vector.load %arg2[%c20, %c0_42, %c0_43] : memref<27x8x512xf32, #tpu.memory_space<vmem>>, vector<1x8x512xf32>
    %103 = vector.shape_cast %102 : vector<1x8x512xf32> to vector<8x512xf32>
    %104 = arith.mulf %101, %103 : vector<8x512xf32>
    %105 = arith.addf %100, %104 : vector<8x512xf32>
    %c449_i32 = arith.constant 449 : i32
    %106 = tpu.dynamic_rotate %0 by %c449_i32 dim 1 : vector<8x512xf32>, i32 -> vector<8x512xf32>
    %c21 = arith.constant 21 : index
    %c0_44 = arith.constant 0 : index
    %c0_45 = arith.constant 0 : index
    %107 = vector.load %arg2[%c21, %c0_44, %c0_45] : memref<27x8x512xf32, #tpu.memory_space<vmem>>, vector<1x8x512xf32>
    %108 = vector.shape_cast %107 : vector<1x8x512xf32> to vector<8x512xf32>
    %109 = arith.mulf %106, %108 : vector<8x512xf32>
    %110 = arith.addf %105, %109 : vector<8x512xf32>
    %c448_i32 = arith.constant 448 : i32
    %111 = tpu.dynamic_rotate %0 by %c448_i32 dim 1 : vector<8x512xf32>, i32 -> vector<8x512xf32>
    %c22 = arith.constant 22 : index
    %c0_46 = arith.constant 0 : index
    %c0_47 = arith.constant 0 : index
    %112 = vector.load %arg2[%c22, %c0_46, %c0_47] : memref<27x8x512xf32, #tpu.memory_space<vmem>>, vector<1x8x512xf32>
    %113 = vector.shape_cast %112 : vector<1x8x512xf32> to vector<8x512xf32>
    %114 = arith.mulf %111, %113 : vector<8x512xf32>
    %115 = arith.addf %110, %114 : vector<8x512xf32>
    %c447_i32 = arith.constant 447 : i32
    %116 = tpu.dynamic_rotate %0 by %c447_i32 dim 1 : vector<8x512xf32>, i32 -> vector<8x512xf32>
    %c23 = arith.constant 23 : index
    %c0_48 = arith.constant 0 : index
    %c0_49 = arith.constant 0 : index
    %117 = vector.load %arg2[%c23, %c0_48, %c0_49] : memref<27x8x512xf32, #tpu.memory_space<vmem>>, vector<1x8x512xf32>
    %118 = vector.shape_cast %117 : vector<1x8x512xf32> to vector<8x512xf32>
    %119 = arith.mulf %116, %118 : vector<8x512xf32>
    %120 = arith.addf %115, %119 : vector<8x512xf32>
    %c441_i32 = arith.constant 441 : i32
    %121 = tpu.dynamic_rotate %0 by %c441_i32 dim 1 : vector<8x512xf32>, i32 -> vector<8x512xf32>
    %c24 = arith.constant 24 : index
    %c0_50 = arith.constant 0 : index
    %c0_51 = arith.constant 0 : index
    %122 = vector.load %arg2[%c24, %c0_50, %c0_51] : memref<27x8x512xf32, #tpu.memory_space<vmem>>, vector<1x8x512xf32>
    %123 = vector.shape_cast %122 : vector<1x8x512xf32> to vector<8x512xf32>
    %124 = arith.mulf %121, %123 : vector<8x512xf32>
    %125 = arith.addf %120, %124 : vector<8x512xf32>
    %c440_i32 = arith.constant 440 : i32
    %126 = tpu.dynamic_rotate %0 by %c440_i32 dim 1 : vector<8x512xf32>, i32 -> vector<8x512xf32>
    %c25 = arith.constant 25 : index
    %c0_52 = arith.constant 0 : index
    %c0_53 = arith.constant 0 : index
    %127 = vector.load %arg2[%c25, %c0_52, %c0_53] : memref<27x8x512xf32, #tpu.memory_space<vmem>>, vector<1x8x512xf32>
    %128 = vector.shape_cast %127 : vector<1x8x512xf32> to vector<8x512xf32>
    %129 = arith.mulf %126, %128 : vector<8x512xf32>
    %130 = arith.addf %125, %129 : vector<8x512xf32>
    %c439_i32 = arith.constant 439 : i32
    %131 = tpu.dynamic_rotate %0 by %c439_i32 dim 1 : vector<8x512xf32>, i32 -> vector<8x512xf32>
    %c26 = arith.constant 26 : index
    %c0_54 = arith.constant 0 : index
    %c0_55 = arith.constant 0 : index
    %132 = vector.load %arg2[%c26, %c0_54, %c0_55] : memref<27x8x512xf32, #tpu.memory_space<vmem>>, vector<1x8x512xf32>
    %133 = vector.shape_cast %132 : vector<1x8x512xf32> to vector<8x512xf32>
    %134 = arith.mulf %131, %133 : vector<8x512xf32>
    %135 = arith.addf %130, %134 : vector<8x512xf32>
    %c0_56 = arith.constant 0 : index
    %c0_57 = arith.constant 0 : index
    %136 = vector.load %arg3[%c0_56, %c0_57] : memref<16x8xf32, #tpu.memory_space<vmem>>, vector<16x8xf32>
    %cst_58 = arith.constant dense<0.000000e+00> : vector<16x512xf32>
    %137 = tpu.matmul %136, %135, %cst_58 {dimension_numbers = #tpu.dot_dimension_numbers<[1], [0], [0], [1], [0, 0, 1, 1], [], []>} : vector<16x8xf32>, vector<8x512xf32>, vector<16x512xf32> -> vector<16x512xf32>
    %c0_59 = arith.constant 0 : index
    %c0_60 = arith.constant 0 : index
    %138 = vector.load %arg4[%c0_59, %c0_60] : memref<16x1xf32, #tpu.memory_space<vmem>>, vector<16x1xf32>
    %139 = vector.broadcast %138 : vector<16x1xf32> to vector<16x512xf32>
    %140 = arith.addf %137, %139 : vector<16x512xf32>
    %c0_61 = arith.constant 0 : index
    %c0_62 = arith.constant 0 : index
    %141 = vector.load %arg5[%c0_61, %c0_62] : memref<16x512xf32, #tpu.memory_space<vmem>>, vector<16x512xf32>
    tpu.vector_store %arg5[%c0_61, %c0_62], %140 {strides = array<i32>} : memref<16x512xf32, #tpu.memory_space<vmem>>, vector<16x512xf32>,
    return
  }
  func.func @transform_0(%arg0: i32) -> (i32, i32) {
    %c0_i32 = arith.constant 0 : i32
    %c0_i32_0 = arith.constant 0 : i32
    %c0_i32_1 = arith.constant 0 : i32
    return %c0_i32, %c0_i32_0 : i32, i32
  }
  func.func @transform_1(%arg0: i32) -> (i32, i32, i32) {
    %c0_i32 = arith.constant 0 : i32
    %c0_i32_0 = arith.constant 0 : i32
    %c0_i32_1 = arith.constant 0 : i32
    %c0_i32_2 = arith.constant 0 : i32
    return %c0_i32, %c0_i32_0, %c0_i32_1 : i32, i32, i32
  }
  func.func @transform_2(%arg0: i32) -> (i32, i32) {
    %c0_i32 = arith.constant 0 : i32
    %c0_i32_0 = arith.constant 0 : i32
    %c0_i32_1 = arith.constant 0 : i32
    return %c0_i32, %c0_i32_0 : i32, i32
  }
  func.func @transform_3(%arg0: i32) -> (i32, i32) {
    %c0_i32 = arith.constant 0 : i32
    %c0_i32_0 = arith.constant 0 : i32
    %c0_i32_1 = arith.constant 0 : i32
    return %c0_i32, %c0_i32_0 : i32, i32
  }
  func.func @transform_4(%arg0: i32) -> (i32, i32) {
    %c0_i32 = arith.constant 0 : i32
    %c0_i32_0 = arith.constant 0 : i32
    %c0_i32_1 = arith.constant 0 : i32
    return %c0_i32, %c0_i32_0 : i32, i32
  }
}

</mosaic_0001>

<bundles_post_ra>
// kernel: tile.18
= control target key start
LH: loop header
LB: loop body
LE: loop exit
PB: predicated region body
PF: predicated region fallthrough
CT: control target
= control target key end

     0   :  { %s22_s0 = inlined_call_operand.vmem [shape: f32[8], index: 0, kind: input, shape index: {}]   ;;  %s23_s1 = inlined_call_operand.vmem [shape: f32[2,8], index: 1, kind: output, shape index: {}]  }
   0x1   :  { %v4_v0 = vld [vmem:[%s22_s0] ss:$0 sm:$0xff] }
   0x2   :  { %5 = vst [vmem:[%s23_s1] sm:$0x3] %v4_v0 }

// kernel: tile.0
= control target key start
LH: loop header
LB: loop body
LE: loop exit
PB: predicated region body
PF: predicated region fallthrough
CT: control target
= control target key end

     0   :  { %s66_s8 = smov 125   ;;  %vm7_vm0 = vcmask 7168   ;;  %s67_s11 = smov 126   ;;  %s117_s0 = inlined_call_operand.vmem [shape: f32[2,8], index: 0, kind: input, shape index: {}]   ;;  %s118_s1 = inlined_call_operand.vmem [shape: f32[16,1], index: 1, kind: output, shape index: {}]  }
   0x1   :  { %v4_v0 = vld [vmem:[%s117_s0] sm:$0x3]  ;;  %s65_s0 = smov 127   ;;  %s68_s12 = smov 124  }
   0x2   :  { %5 = vst [vmem:[#allocation0] sm:$0x3] %v4_v0  ;;  %s69_s13 = smov 123   ;;  %s70_s14 = smov 122  }
   0x3   :  { %s71_s15 = smov 121  }
   0x9   :  { %v9_v1 = vld [vmem:[#allocation0] sm:$0x3]  }
   0xa   :  { %v21_v2 = vld [vmem:[#allocation0] sm:$0x3]   ;;  %10 = vrot.lane.b32.xlu0 %v9_v1, %s65_s0 }
   0xb   :  { %22 = vrot.lane.b32.xlu1 %v21_v2, %s66_s8  ;;  %v15_v3 = vld [vmem:[#allocation0] sm:$0x3]  }
   0xc   :  { %v27_v4 = vld [vmem:[#allocation0] sm:$0x3]  }
   0xd   :  { %v6_v5 = vld [vmem:[#allocation0] sm:$0x3]  }
   0xe   :  { %8 = vst.msk [vmem:[%s118_s1] ss:$8 sm:$0x3] %vm7_vm0, %v6_v5   ;;  %16 = vrot.lane.b32.xlu0 %v15_v3, %s67_s11  ;;  %v33_v6 = vld [vmem:[#allocation0] sm:$0x3]  }
   0xf   :  { %28 = vrot.lane.b32.xlu1 %v27_v4, %s68_s12  ;;  %v39_v7 = vld [vmem:[#allocation0] sm:$0x3]  }
  0x10   :  { %v45_v8 = vld [vmem:[#allocation0] sm:$0x3]  }
  0x12   :  { %34 = vrot.lane.b32.xlu0 %v33_v6, %s69_s13 }
  0x13   :  { %40 = vrot.lane.b32.xlu1 %v39_v7, %s70_s14 }
  0x16   :  { %46 = vrot.lane.b32.xlu0 %v45_v8, %s71_s15 }
  0x7c   :  { %v11_v9 = vpop.permute.xlu0 %10  }
  0x7d   :  { %v23_v10 = vpop.permute.xlu1 %22   ;;  %51 = vst.msk [vmem:[%s118_s1 + $0x1] ss:$8 sm:$0x3] %vm7_vm0, %v11_v9  }
  0x7e   :  { %53 = vst.msk [vmem:[%s118_s1 + $0x3] ss:$8 sm:$0x3] %vm7_vm0, %v23_v10  }
  0x80   :  { %v17_v11 = vpop.permute.xlu0 %16  }
  0x81   :  { %v29_v12 = vpop.permute.xlu1 %28   ;;  %52 = vst.msk [vmem:[%s118_s1 + $0x2] ss:$8 sm:$0x3] %vm7_vm0, %v17_v11  }
  0x82   :  { %54 = vst.msk [vmem:[%s118_s1 + $0x4] ss:$8 sm:$0x3] %vm7_vm0, %v29_v12  }
  0x84   :  { %v35_v13 = vpop.permute.xlu0 %34  }
  0x85   :  { %v41_v14 = vpop.permute.xlu1 %40   ;;  %55 = vst.msk [vmem:[%s118_s1 + $0x5] ss:$8 sm:$0x3] %vm7_vm0, %v35_v13  }
  0x86   :  { %56 = vst.msk [vmem:[%s118_s1 + $0x6] ss:$8 sm:$0x3] %vm7_vm0, %v41_v14  }
  0x88   :  { %v47_v15 = vpop.permute.xlu0 %46  }
  0x89   :  { %57 = vst.msk [vmem:[%s118_s1 + $0x7] ss:$8 sm:$0x3] %vm7_vm0, %v47_v15  }

// kernel: depthwise_separable_conv3d.1
= control target key start
LH: loop header
LB: loop body
LE: loop exit
PB: predicated region body
PF: predicated region fallthrough
CT: control target
= control target key end

     0   :  { %s910_s19 = smov 73   ;;  %s911_s24 = smov 72   ;;  %v29_v4 = vlaneseq  ;;  %s1811_s0 = inlined_call_operand.vmem [shape: f32[8,512], index: 0, kind: input, shape index: {}]   ;;  %s1812_s1 = inlined_call_operand.vmem [shape: f32[27,8,512], index: 1, kind: input, shape index: {}]   ;;  %s1813_s3 = inlined_call_operand.vmem [shape: f32[16,1], index: 3, kind: input, shape index: {}]   ;;  %s1814_s2 = inlined_call_operand.vmem [shape: f32[16,8], index: 2, kind: input, shape index: {}]   ;;  %s1815_s4 = inlined_call_operand.vmem [shape: f32[16,512], index: 4, kind: output, shape index: {}]  }
   0x1   :  { %v957_v0 = vld [vmem:[%s1811_s0 + $0x10] sm:$0xff]  ;;  %v962_v1 = vld [vmem:[%s1811_s0] sm:$0xff]  ;;  %v969_v2 = vld [vmem:[%s1811_s0 + $0x18] sm:$0xff]  ;;  %s912_s25 = smov 71   ;;  %s914_s26 = smov 64  }
   0x2   :  { %25 = vrot.lane.b32.xlu1 %v957_v0, %s910_s19  ;;  %21 = vrot.lane.b32.xlu0 %v962_v1, %s910_s19  ;;  %v974_v3 = vld [vmem:[%s1811_s0 + $0x8] sm:$0xff]  ;;  %s913_s0 = smov 65   ;;  %s915_s27 = smov 63   ;;  %v1032_v5 = vand.u32 127, %v29_v4  ;;  %v36_v18 = vld [vmem:[%s1812_s1] sm:$0xff] }
   0x3   :  { %s916_s28 = smov 57   ;;  %s917_s29 = smov 56   ;;  %v37_v14 = vld [vmem:[%s1812_s1 + $0x8] sm:$0xff]  ;;  %v39_v20 = vld [vmem:[%s1812_s1 + $0x18] sm:$0xff]  ;;  %v38_v21 = vld [vmem:[%s1812_s1 + $0x10] sm:$0xff] }
   0x4   :  { %s918_s30 = smov 55   ;;  %s919_s5 = smov 9   ;;  %vm31_vm0 = vcmp.lt.s32.totalorder %v1032_v5, 73  ;;  %vm56_vm1 = vcmp.lt.s32.totalorder %v1032_v5, 72  ;;  %v782_v15 = vld [vmem:[%s1812_s1 + $0x28] sm:$0xff]  ;;  %v781_v24 = vld [vmem:[%s1812_s1 + $0x20] sm:$0xff] }
   0x5   :  { %s920_s6 = smov 8   ;;  %s921_s7 = smov 7   ;;  %v783_v25 = vld [vmem:[%s1812_s1 + $0x30] sm:$0xff]  ;;  %v784_v26 = vld [vmem:[%s1812_s1 + $0x38] sm:$0xff]  ;;  %vm82_vm2 = vcmp.lt.s32.totalorder %v1032_v5, 71  ;;  %v786_v39 = vld [vmem:[%s1812_s1 + $0x48] sm:$0xff] }
   0x6   :  { %27 = vrot.lane.b32.xlu1 %v969_v2, %s910_s19  ;;  %23 = vrot.lane.b32.xlu0 %v974_v3, %s910_s19  ;;  %s922_s8 = smov 1   ;;  %s923_s9 = smov 127   ;;  %v785_v47 = vld [vmem:[%s1812_s1 + $0x40] sm:$0xff]  ;;  %v787_v48 = vld [vmem:[%s1812_s1 + $0x50] sm:$0xff]  ;;  %vm108_vm3 = vcmp.lt.s32.totalorder %v1032_v5, 65  ;;  %vm134_vm4 = vcmp.lt.s32.totalorder %v1032_v5, 64 }
   0x7   :  { %s924_s10 = smov 121   ;;  %s925_s11 = smov 120   ;;  %v788_v49 = vld [vmem:[%s1812_s1 + $0x58] sm:$0xff]  ;;  %v790_v59 = vld [vmem:[%s1812_s1 + $0x68] sm:$0xff]  ;;  %vm160_vm5 = vcmp.lt.s32.totalorder %v1032_v5, 63  ;;  %vm186_vm6 = vcmp.lt.s32.totalorder %v1032_v5, 57 }
   0x8   :  { %vm212_vm7 = vcmp.lt.s32.totalorder %v1032_v5, 56  ;;  %vm238_vm8 = vcmp.lt.s32.totalorder %v1032_v5, 55  ;;  %vm264_vm9 = vcmp.lt.s32.totalorder %v1032_v5, 9  ;;  %vm290_vm10 = vcmp.lt.s32.totalorder %v1032_v5, 8 }
   0x9   :  { %vm316_vm11 = vcmp.lt.s32.totalorder %v1032_v5, 7  ;;  %vm342_vm12 = vcmp.lt.s32.totalorder %v1032_v5, 1  ;;  %vm381_vm13 = vcmp.lt.s32.totalorder %v1032_v5, 127  ;;  %vm407_vm14 = vcmp.lt.s32.totalorder %v1032_v5, 121 }
   0xa   :  { %50 = vrot.lane.b32.xlu1 %v974_v3, %s911_s24  ;;  %48 = vrot.lane.b32.xlu0 %v962_v1, %s911_s24  ;;  %vm433_vm15 = vcmp.lt.s32.totalorder %v1032_v5, 120 }
   0xe   :  { %54 = vrot.lane.b32.xlu1 %v969_v2, %s911_s24  ;;  %52 = vrot.lane.b32.xlu0 %v957_v0, %s911_s24 }
  0x12   :  { %76 = vrot.lane.b32.xlu1 %v974_v3, %s912_s25  ;;  %74 = vrot.lane.b32.xlu0 %v962_v1, %s912_s25 }
  0x16   :  { %80 = vrot.lane.b32.xlu1 %v969_v2, %s912_s25  ;;  %78 = vrot.lane.b32.xlu0 %v957_v0, %s912_s25 }
  0x1a   :  { %102 = vrot.lane.b32.xlu1 %v974_v3, %s913_s0  ;;  %100 = vrot.lane.b32.xlu0 %v962_v1, %s913_s0 }
  0x1e   :  { %106 = vrot.lane.b32.xlu1 %v969_v2, %s913_s0  ;;  %104 = vrot.lane.b32.xlu0 %v957_v0, %s913_s0 }
  0x22   :  { %128 = vrot.lane.b32.xlu1 %v974_v3, %s914_s26  ;;  %126 = vrot.lane.b32.xlu0 %v962_v1, %s914_s26 }
  0x26   :  { %132 = vrot.lane.b32.xlu1 %v969_v2, %s914_s26  ;;  %130 = vrot.lane.b32.xlu0 %v957_v0, %s914_s26 }
  0x2a   :  { %154 = vrot.lane.b32.xlu1 %v974_v3, %s915_s27  ;;  %152 = vrot.lane.b32.xlu0 %v962_v1, %s915_s27 }
  0x2e   :  { %158 = vrot.lane.b32.xlu1 %v969_v2, %s915_s27  ;;  %156 = vrot.lane.b32.xlu0 %v957_v0, %s915_s27  ;;  %s926_s27 = smov 119  }
  0x32   :  { %180 = vrot.lane.b32.xlu1 %v974_v3, %s916_s28  ;;  %178 = vrot.lane.b32.xlu0 %v962_v1, %s916_s28 }
  0x36   :  { %184 = vrot.lane.b32.xlu1 %v969_v2, %s916_s28  ;;  %182 = vrot.lane.b32.xlu0 %v957_v0, %s916_s28 }
  0x3a   :  { %206 = vrot.lane.b32.xlu1 %v974_v3, %s917_s29  ;;  %204 = vrot.lane.b32.xlu0 %v962_v1, %s917_s29 }
  0x3e   :  { %210 = vrot.lane.b32.xlu1 %v969_v2, %s917_s29  ;;  %208 = vrot.lane.b32.xlu0 %v957_v0, %s917_s29 }
  0x42   :  { %232 = vrot.lane.b32.xlu1 %v974_v3, %s918_s30  ;;  %230 = vrot.lane.b32.xlu0 %v962_v1, %s918_s30 }
  0x46   :  { %236 = vrot.lane.b32.xlu1 %v969_v2, %s918_s30  ;;  %234 = vrot.lane.b32.xlu0 %v957_v0, %s918_s30 }
  0x4a   :  { %258 = vrot.lane.b32.xlu1 %v974_v3, %s919_s5  ;;  %256 = vrot.lane.b32.xlu0 %v962_v1, %s919_s5 }
  0x4e   :  { %262 = vrot.lane.b32.xlu1 %v969_v2, %s919_s5  ;;  %260 = vrot.lane.b32.xlu0 %v957_v0, %s919_s5 }
  0x52   :  { %284 = vrot.lane.b32.xlu1 %v974_v3, %s920_s6  ;;  %282 = vrot.lane.b32.xlu0 %v962_v1, %s920_s6 }
  0x56   :  { %288 = vrot.lane.b32.xlu1 %v969_v2, %s920_s6  ;;  %286 = vrot.lane.b32.xlu0 %v957_v0, %s920_s6 }
  0x5a   :  { %310 = vrot.lane.b32.xlu1 %v974_v3, %s921_s7  ;;  %308 = vrot.lane.b32.xlu0 %v962_v1, %s921_s7 }
  0x5e   :  { %314 = vrot.lane.b32.xlu1 %v969_v2, %s921_s7  ;;  %312 = vrot.lane.b32.xlu0 %v957_v0, %s921_s7 }
  0x62   :  { %336 = vrot.lane.b32.xlu1 %v974_v3, %s922_s8  ;;  %334 = vrot.lane.b32.xlu0 %v962_v1, %s922_s8 }
  0x66   :  { %340 = vrot.lane.b32.xlu1 %v969_v2, %s922_s8  ;;  %338 = vrot.lane.b32.xlu0 %v957_v0, %s922_s8 }
  0x6a   :  { %375 = vrot.lane.b32.xlu1 %v974_v3, %s923_s9  ;;  %373 = vrot.lane.b32.xlu0 %v962_v1, %s923_s9 }
  0x6e   :  { %379 = vrot.lane.b32.xlu1 %v969_v2, %s923_s9  ;;  %377 = vrot.lane.b32.xlu0 %v957_v0, %s923_s9 }
  0x72   :  { %401 = vrot.lane.b32.xlu1 %v974_v3, %s924_s10  ;;  %399 = vrot.lane.b32.xlu0 %v962_v1, %s924_s10 }
  0x74   :  { %v26_v6 = vpop.permute.xlu1 %25  ;;  %v22_v7 = vpop.permute.xlu0 %21 }
  0x76   :  { %405 = vrot.lane.b32.xlu1 %v969_v2, %s924_s10  ;;  %403 = vrot.lane.b32.xlu0 %v957_v0, %s924_s10 }
  0x78   :  { %v28_v8 = vpop.permute.xlu1 %27  ;;  %v24_v9 = vpop.permute.xlu0 %23 }
  0x79   :  { %v1037_v10 = vsel %vm31_vm0, %v26_v6, %v28_v8  ;;  %v1039_v11 = vsel %vm31_vm0, %v28_v8, %v22_v7  ;;  %v1041_v12 = vsel %vm31_vm0, %v24_v9, %v26_v6  ;;  %v1043_v13 = vsel %vm31_vm0, %v22_v7, %v24_v9  ;;  %v789_v8 = vld [vmem:[%s1812_s1 + $0x60] sm:$0xff]  ;;  %v791_v9 = vld [vmem:[%s1812_s1 + $0x70] sm:$0xff] }
  0x7a   :  { %427 = vrot.lane.b32.xlu1 %v974_v3, %s925_s11  ;;  %425 = vrot.lane.b32.xlu0 %v962_v1, %s925_s11  ;;  %v41_v22 = vmul.f32 %v37_v14, %v1043_v13  ;;  %v40_v27 = vmul.f32 %v36_v18, %v1039_v11  ;;  %v43_v31 = vmul.f32 %v39_v20, %v1037_v10  ;;  %v792_v14 = vld [vmem:[%s1812_s1 + $0x78] sm:$0xff]  ;;  %vm459_vm0 = vcmp.lt.s32.totalorder %v1032_v5, 119 }
  0x7b   :  { %v42_v35 = vmul.f32 %v38_v21, %v1041_v12 }
  0x7c   :  { %v51_v16 = vpop.permute.xlu1 %50  ;;  %v49_v17 = vpop.permute.xlu0 %48 }
  0x7d   :  { %v1059_v19 = vsel %vm56_vm1, %v49_v17, %v51_v16 }
  0x7e   :  { %v67_v23 = vmul.f32 %v782_v15, %v1059_v19  ;;  %431 = vrot.lane.b32.xlu1 %v969_v2, %s925_s11  ;;  %429 = vrot.lane.b32.xlu0 %v957_v0, %s925_s11 }
  0x80   :  { %v71_v28 = vadd.f32 %v67_v23, %v41_v22  ;;  %v55_v29 = vpop.permute.xlu1 %54  ;;  %v53_v30 = vpop.permute.xlu0 %52 }
  0x81   :  { %v1085_v32 = vsel %vm56_vm1, %v55_v29, %v49_v17  ;;  %v1089_v33 = vsel %vm56_vm1, %v53_v30, %v55_v29  ;;  %v1093_v34 = vsel %vm56_vm1, %v51_v16, %v53_v30  ;;  %vm608_vm1 = vcmask 64512  }
  0x82   :  { %v66_v36 = vmul.f32 %v781_v24, %v1085_v32  ;;  %v68_v37 = vmul.f32 %v783_v25, %v1093_v34  ;;  %v69_v38 = vmul.f32 %v784_v26, %v1089_v33  ;;  %453 = vrot.lane.b32.xlu1 %v974_v3, %s926_s27  ;;  %451 = vrot.lane.b32.xlu0 %v962_v1, %s926_s27  ;;  %v1816_v25 = vmov 0.0   ;;  %v794_v26 = vld [vmem:[%s1812_s1 + $0x88] sm:$0xff] }
  0x83   :  { %679 = vmatprep.mubr.f32.mxu0 %v1816_v25  ;;  %756 = vmatprep.mubr.f32.mxu1 %v1816_v25  ;;  %v803_v25 = vld [vmem:[%s1812_s1 + $0xd0] sm:$0xff] }
  0x84   :  { %v70_v40 = vadd.f32 %v66_v36, %v40_v27  ;;  %v72_v41 = vadd.f32 %v68_v37, %v42_v35  ;;  %v73_v42 = vadd.f32 %v69_v38, %v43_v31  ;;  %v77_v43 = vpop.permute.xlu1 %76  ;;  %v75_v44 = vpop.permute.xlu0 %74  ;;  %v793_v37 = vld [vmem:[%s1812_s1 + $0x80] sm:$0xff]  ;;  %v795_v38 = vld [vmem:[%s1812_s1 + $0x90] sm:$0xff] }
  0x85   :  { %v1106_v45 = vsel %vm82_vm2, %v75_v44, %v77_v43 }
  0x86   :  { %v93_v46 = vmul.f32 %v786_v39, %v1106_v45  ;;  %457 = vrot.lane.b32.xlu1 %v969_v2, %s926_s27  ;;  %455 = vrot.lane.b32.xlu0 %v957_v0, %s926_s27  ;;  %v796_v39 = vld [vmem:[%s1812_s1 + $0x98] sm:$0xff] }
  0x88   :  { %v97_v50 = vadd.f32 %v93_v46, %v71_v28  ;;  %v81_v51 = vpop.permute.xlu1 %80  ;;  %v79_v52 = vpop.permute.xlu0 %78  ;;  %v597_v46 = vld [vmem:[%s1813_s3 + $0x8] sm:$0xff] }
  0x89   :  { %v1122_v53 = vsel %vm82_vm2, %v81_v51, %v75_v44  ;;  %v1126_v54 = vsel %vm82_vm2, %v79_v52, %v81_v51  ;;  %v1130_v55 = vsel %vm82_vm2, %v77_v43, %v79_v52  ;;  %v928_v43 = vmov 0   ;;  %v596_v44 = vld [vmem:[%s1813_s3] sm:$0xff] }
  0x8a   :  { %v92_v56 = vmul.f32 %v785_v47, %v1122_v53  ;;  %v94_v57 = vmul.f32 %v787_v48, %v1130_v55  ;;  %v95_v58 = vmul.f32 %v788_v49, %v1126_v54  ;;  %908 = vset.pattern.permute.xlu0 %v928_v43  ;;  %909 = vset.pattern.permute.xlu1 %v928_v43 }
  0x8b   :  { %600 = vperm.xlu0 %908, %v596_v44   ;;  %605 = vperm.xlu1 %909, %v597_v46  }
  0x8c   :  { %v96_v60 = vadd.f32 %v92_v56, %v70_v40  ;;  %v98_v61 = vadd.f32 %v94_v57, %v72_v41  ;;  %v99_v62 = vadd.f32 %v95_v58, %v73_v42  ;;  %v103_v63 = vpop.permute.xlu1 %102  ;;  %v101_v4 = vpop.permute.xlu0 %100  ;;  %v798_v56 = vld [vmem:[%s1812_s1 + $0xa8] sm:$0xff] }
  0x8d   :  { %v1141_v6 = vsel %vm108_vm3, %v101_v4, %v103_v63 }
  0x8e   :  { %v119_v7 = vmul.f32 %v790_v59, %v1141_v6 }
  0x90   :  { %v123_v15 = vadd.f32 %v119_v7, %v97_v50  ;;  %v107_v16 = vpop.permute.xlu1 %106  ;;  %v105_v17 = vpop.permute.xlu0 %104  ;;  %v799_v7 = vld [vmem:[%s1812_s1 + $0xb0] sm:$0xff] }
  0x91   :  { %v1155_v18 = vsel %vm108_vm3, %v107_v16, %v101_v4  ;;  %v1159_v20 = vsel %vm108_vm3, %v105_v17, %v107_v16  ;;  %v1163_v21 = vsel %vm108_vm3, %v103_v63, %v105_v17  ;;  %v797_v4 = vld [vmem:[%s1812_s1 + $0xa0] sm:$0xff] }
  0x92   :  { %1839 = vst [vmem:[#allocation2_spill] sm:$0xff] %v1155_v18  ;;  %1840 = vst [vmem:[#allocation3_spill] sm:$0xff] %v1159_v20  ;;  %v118_v22 = vmul.f32 %v789_v8, %v1155_v18  ;;  %v120_v23 = vmul.f32 %v791_v9, %v1163_v21  ;;  %v121_v24 = vmul.f32 %v792_v14, %v1159_v20  ;;  %v800_v8 = vld [vmem:[%s1812_s1 + $0xb8] sm:$0xff] }
  0x93   :  { %1841 = vst [vmem:[#allocation4_spill] sm:$0xff] %v1163_v21  ;;  %v829_v21 = vld [vmem:[%s1812_s1 + $0x1a0] sm:$0xff] }
  0x94   :  { %v122_v27 = vadd.f32 %v118_v22, %v96_v60  ;;  %v124_v28 = vadd.f32 %v120_v23, %v98_v61  ;;  %v125_v29 = vadd.f32 %v121_v24, %v99_v62  ;;  %v129_v30 = vpop.permute.xlu1 %128  ;;  %v127_v31 = vpop.permute.xlu0 %126 }
  0x95   :  { %v1176_v35 = vsel %vm134_vm4, %v127_v31, %v129_v30 }
  0x96   :  { %v145_v36 = vmul.f32 %v794_v26, %v1176_v35 }
  0x98   :  { %v149_v40 = vadd.f32 %v145_v36, %v123_v15  ;;  %v133_v41 = vpop.permute.xlu1 %132  ;;  %v131_v42 = vpop.permute.xlu0 %130 }
  0x99   :  { %v1196_v47 = vsel %vm134_vm4, %v133_v41, %v127_v31  ;;  %v1200_v48 = vsel %vm134_vm4, %v131_v42, %v133_v41  ;;  %v1204_v49 = vsel %vm134_vm4, %v129_v30, %v131_v42 }
  0x9a   :  { %1842 = vst [vmem:[#allocation5_spill] sm:$0xff] %v1196_v47  ;;  %1843 = vst [vmem:[#allocation6_spill] sm:$0xff] %v1200_v48  ;;  %v144_v50 = vmul.f32 %v793_v37, %v1196_v47  ;;  %v146_v51 = vmul.f32 %v795_v38, %v1204_v49  ;;  %v147_v52 = vmul.f32 %v796_v39, %v1200_v48  ;;  %v806_v48 = vld [vmem:[%s1812_s1 + $0xe8] sm:$0xff] }
  0x9b   :  { %1844 = vst [vmem:[#allocation7_spill] sm:$0xff] %v1204_v49 }
  0x9c   :  { %v148_v57 = vadd.f32 %v144_v50, %v122_v27  ;;  %v150_v58 = vadd.f32 %v146_v51, %v124_v28  ;;  %v151_v59 = vadd.f32 %v147_v52, %v125_v29  ;;  %v155_v60 = vpop.permute.xlu1 %154  ;;  %v153_v61 = vpop.permute.xlu0 %152 }
  0x9d   :  { %v1215_v62 = vsel %vm160_vm5, %v153_v61, %v155_v60 }
  0x9e   :  { %1845 = vst [vmem:[#allocation8_spill] sm:$0xff] %v1215_v62  ;;  %v171_v63 = vmul.f32 %v798_v56, %v1215_v62 }
  0xa0   :  { %v1227_v9 = vadd.f32 %v171_v63, %v149_v40  ;;  %v159_v14 = vpop.permute.xlu1 %158  ;;  %v157_v15 = vpop.permute.xlu0 %156 }
  0xa1   :  { %v1231_v16 = vsel %vm160_vm5, %v159_v14, %v153_v61  ;;  %v1235_v17 = vsel %vm160_vm5, %v157_v15, %v159_v14  ;;  %v1239_v22 = vsel %vm160_vm5, %v155_v60, %v157_v15  ;;  %v802_v15 = vld [vmem:[%s1812_s1 + $0xc8] sm:$0xff] }
  0xa2   :  { %1846 = vst [vmem:[#allocation9_spill] sm:$0xff] %v1231_v16  ;;  %1847 = vst [vmem:[#allocation10_spill] sm:$0xff] %v1235_v17  ;;  %v170_v23 = vmul.f32 %v797_v4, %v1231_v16  ;;  %v172_v24 = vmul.f32 %v799_v7, %v1239_v22  ;;  %v173_v26 = vmul.f32 %v800_v8, %v1235_v17 }
  0xa3   :  { %1848 = vst [vmem:[#allocation11_spill] sm:$0xff] %v1239_v22  ;;  %v804_v22 = vld [vmem:[%s1812_s1 + $0xd8] sm:$0xff] }
  0xa4   :  { %v1244_v27 = vadd.f32 %v170_v23, %v148_v57  ;;  %v1246_v28 = vadd.f32 %v172_v24, %v150_v58  ;;  %v1248_v29 = vadd.f32 %v173_v26, %v151_v59  ;;  %v181_v30 = vpop.permute.xlu1 %180  ;;  %v179_v31 = vpop.permute.xlu0 %178  ;;  %v801_v24 = vld [vmem:[%s1812_s1 + $0xc0] sm:$0xff] }
  0xa5   :  { %v1289_v23 = vsel %vm186_vm6, %v179_v31, %v181_v30 }
  0xa6   :  { %1849 = vst [vmem:[#allocation12_spill] sm:$0xff] %v1289_v23  ;;  %v197_v49 = vmul.f32 %v802_v15, %v1289_v23  ;;  %v830_v15 = vld [vmem:[%s1812_s1 + $0x1a8] sm:$0xff] }
  0xa8   :  { %v185_v36 = vpop.permute.xlu1 %184  ;;  %v183_v37 = vpop.permute.xlu0 %182 }
  0xa9   :  { %v1294_v26 = vsel %vm186_vm6, %v185_v36, %v179_v31  ;;  %v1299_v17 = vsel %vm186_vm6, %v181_v30, %v183_v37  ;;  %v1304_v16 = vsel %vm186_vm6, %v183_v37, %v185_v36  ;;  %v805_v30 = vld [vmem:[%s1812_s1 + $0xe0] sm:$0xff] }
  0xaa   :  { %1850 = vst [vmem:[#allocation13_spill] sm:$0xff] %v1294_v26  ;;  %1851 = vst [vmem:[#allocation14_spill] sm:$0xff] %v1299_v17  ;;  %v196_v23 = vmul.f32 %v801_v24, %v1294_v26  ;;  %v198_v62 = vmul.f32 %v803_v25, %v1299_v17  ;;  %v199_v18 = vmul.f32 %v804_v22, %v1304_v16  ;;  %v808_v25 = vld [vmem:[%s1812_s1 + $0xf8] sm:$0xff] }
  0xab   :  { %1852 = vst [vmem:[#allocation15_spill] sm:$0xff] %v1304_v16 }
  0xac   :  { %v207_v38 = vpop.permute.xlu1 %206  ;;  %v205_v39 = vpop.permute.xlu0 %204 }
  0xad   :  { %v1311_v31 = vsel %vm212_vm7, %v205_v39, %v207_v38 }
  0xae   :  { %1853 = vst [vmem:[#allocation16_spill] sm:$0xff] %v1311_v31  ;;  %v223_v24 = vmul.f32 %v806_v48, %v1311_v31  ;;  %v1364_v48 = vmul.f32 %v830_v15, %v974_v3  ;;  %v812_v31 = vld [vmem:[%s1812_s1 + $0x118] sm:$0xff]  ;;  %v1381_v3 = vmul.f32 %v829_v21, %v962_v1  ;;  %v203_v1 = vadd.f32 %v199_v18, %v1248_v29 }
  0xb0   :  { %v211_v40 = vpop.permute.xlu1 %210  ;;  %v209_v41 = vpop.permute.xlu0 %208 }
  0xb1   :  { %v1319_v47 = vsel %vm212_vm7, %v211_v40, %v205_v39  ;;  %v807_v39 = vld [vmem:[%s1812_s1 + $0xf0] sm:$0xff]  ;;  %v1337_v20 = vsel %vm212_vm7, %v207_v38, %v209_v41  ;;  %v1350_v17 = vsel %vm212_vm7, %v209_v41, %v211_v40  ;;  %v809_v38 = vld [vmem:[%s1812_s1 + $0x100] sm:$0xff]  ;;  %v201_v40 = vadd.f32 %v197_v49, %v1227_v9 }
  0xb2   :  { %1854 = vst [vmem:[#allocation17_spill] sm:$0xff] %v1319_v47  ;;  %1855 = vst [vmem:[#allocation18_spill] sm:$0xff] %v1337_v20  ;;  %v222_v22 = vmul.f32 %v805_v30, %v1319_v47  ;;  %v224_v41 = vmul.f32 %v807_v39, %v1337_v20  ;;  %v200_v49 = vadd.f32 %v196_v23, %v1244_v27  ;;  %v813_v39 = vld [vmem:[%s1812_s1 + $0x120] sm:$0xff]  ;;  %v810_v27 = vld [vmem:[%s1812_s1 + $0x108] sm:$0xff] }
  0xb3   :  { %v225_v9 = vmul.f32 %v808_v25, %v1350_v17  ;;  %v202_v20 = vadd.f32 %v198_v62, %v1246_v28  ;;  %v227_v21 = vadd.f32 %v223_v24, %v201_v40  ;;  %v816_v62 = vld [vmem:[%s1812_s1 + $0x138] sm:$0xff]  ;;  %v817_v28 = vld [vmem:[%s1812_s1 + $0x140] sm:$0xff] }
  0xb4   :  { %v1250_v42 = vpop.permute.xlu1 %232  ;;  %v1252_v43 = vpop.permute.xlu0 %230  ;;  %v226_v25 = vadd.f32 %v222_v22, %v200_v49 }
  0xb5   :  { %v1402_v23 = vsel %vm238_vm8, %v1252_v43, %v1250_v42  ;;  %v229_v49 = vadd.f32 %v225_v9, %v203_v1 }
  0xb6   :  { %1858 = vst [vmem:[#allocation21_spill] sm:$0xff] %v1402_v23 }
  0xb8   :  { %v237_v44 = vpop.permute.xlu1 %236  ;;  %v1254_v46 = vpop.permute.xlu0 %234 }
  0xb9   :  { %v1358_v26 = vsel %vm238_vm8, %v237_v44, %v1252_v43  ;;  %v1374_v16 = vsel %vm238_vm8, %v1254_v46, %v237_v44  ;;  %v228_v43 = vadd.f32 %v224_v41, %v202_v20  ;;  %v1426_v24 = vsel %vm238_vm8, %v1250_v42, %v1254_v46  ;;  %v820_v42 = vld [vmem:[%s1812_s1 + $0x158] sm:$0xff] }
  0xba   :  { %1856 = vst [vmem:[#allocation19_spill] sm:$0xff] %v1358_v26  ;;  %1857 = vst [vmem:[#allocation20_spill] sm:$0xff] %v1374_v16  ;;  %v248_v15 = vmul.f32 %v809_v38, %v1358_v26  ;;  %v251_v38 = vmul.f32 %v812_v31, %v1374_v16  ;;  %v811_v31 = vld [vmem:[%s1812_s1 + $0x110] sm:$0xff]  ;;  %v249_v16 = vmul.f32 %v810_v27, %v1402_v23  ;;  %v818_v23 = vld [vmem:[%s1812_s1 + $0x148] sm:$0xff] }
  0xbb   :  { %1859 = vst [vmem:[#allocation22_spill] sm:$0xff] %v1426_v24  ;;  %v250_v1 = vmul.f32 %v811_v31, %v1426_v24  ;;  %v828_v24 = vld [vmem:[%s1812_s1 + $0x198] sm:$0xff] }
  0xbc   :  { %v1256_v50 = vpop.permute.xlu1 %258  ;;  %v1258_v51 = vpop.permute.xlu0 %256  ;;  %v252_v26 = vadd.f32 %v248_v15, %v226_v25  ;;  %v255_v27 = vadd.f32 %v251_v38, %v229_v49  ;;  %v253_v31 = vadd.f32 %v249_v16, %v227_v21  ;;  %v822_v21 = vld [vmem:[%s1812_s1 + $0x168] sm:$0xff] }
  0xbd   :  { %v267_v22 = vsel %vm264_vm9, %v1258_v51, %v1256_v50 }
  0xc0   :  { %v1260_v52 = vpop.permute.xlu1 %262  ;;  %v1262_v56 = vpop.permute.xlu0 %260 }
  0xc1   :  { %v268_v44 = vsel %vm264_vm9, %v1260_v52, %v1258_v51  ;;  %v265_v18 = vsel %vm264_vm9, %v1262_v56, %v1260_v52  ;;  %v814_v52 = vld [vmem:[%s1812_s1 + $0x128] sm:$0xff]  ;;  %v815_v51 = vld [vmem:[%s1812_s1 + $0x130] sm:$0xff]  ;;  %v266_v9 = vsel %vm264_vm9, %v1256_v50, %v1262_v56 }
  0xc2   :  { %v274_v20 = vmul.f32 %v813_v39, %v268_v44  ;;  %v277_v15 = vmul.f32 %v816_v62, %v265_v18  ;;  %v821_v44 = vld [vmem:[%s1812_s1 + $0x160] sm:$0xff]  ;;  %v275_v25 = vmul.f32 %v814_v52, %v267_v22  ;;  %v824_v18 = vld [vmem:[%s1812_s1 + $0x178] sm:$0xff]  ;;  %v276_v52 = vmul.f32 %v815_v51, %v266_v9  ;;  %v819_v22 = vld [vmem:[%s1812_s1 + $0x150] sm:$0xff] }
  0xc3   :  { %v832_v9 = vld [vmem:[%s1812_s1 + $0x1b8] sm:$0xff] }
  0xc4   :  { %v1264_v57 = vpop.permute.xlu1 %284  ;;  %v1266_v58 = vpop.permute.xlu0 %282  ;;  %v278_v56 = vadd.f32 %v274_v20, %v252_v26  ;;  %v281_v49 = vadd.f32 %v277_v15, %v255_v27  ;;  %v254_v15 = vadd.f32 %v250_v1, %v228_v43 }
  0xc5   :  { %v293_v50 = vsel %vm290_vm10, %v1266_v58, %v1264_v57 }
  0xc8   :  { %v1268_v59 = vpop.permute.xlu1 %288  ;;  %v1270_v60 = vpop.permute.xlu0 %286 }
  0xc9   :  { %v294_v29 = vsel %vm290_vm10, %v1268_v59, %v1266_v58  ;;  %v291_v46 = vsel %vm290_vm10, %v1270_v60, %v1268_v59 }
  0xca   :  { %v300_v39 = vmul.f32 %v817_v28, %v294_v29  ;;  %v303_v62 = vmul.f32 %v820_v42, %v291_v46  ;;  %v825_v28 = vld [vmem:[%s1812_s1 + $0x180] sm:$0xff]  ;;  %v301_v42 = vmul.f32 %v818_v23, %v293_v50 }
  0xcc   :  { %v1272_v61 = vpop.permute.xlu1 %310  ;;  %v1274_v63 = vpop.permute.xlu0 %308  ;;  %v304_v46 = vadd.f32 %v300_v39, %v278_v56  ;;  %v279_v39 = vadd.f32 %v275_v25, %v253_v31  ;;  %v826_v56 = vld [vmem:[%s1812_s1 + $0x188] sm:$0xff]  ;;  %v280_v25 = vadd.f32 %v276_v52, %v254_v15 }
  0xd0   :  { %v1276_v4 = vpop.permute.xlu1 %314  ;;  %v1278_v7 = vpop.permute.xlu0 %312 }
  0xd1   :  { %v320_v59 = vsel %vm316_vm11, %v1276_v4, %v1274_v63  ;;  %v317_v38 = vsel %vm316_vm11, %v1278_v7, %v1276_v4  ;;  %v292_v4 = vsel %vm290_vm10, %v1264_v57, %v1270_v60  ;;  %v319_v57 = vsel %vm316_vm11, %v1274_v63, %v1272_v61  ;;  %v823_v60 = vld [vmem:[%s1812_s1 + $0x170] sm:$0xff] }
  0xd2   :  { %v326_v20 = vmul.f32 %v821_v44, %v320_v59  ;;  %v318_v23 = vsel %vm316_vm11, %v1272_v61, %v1278_v7  ;;  %v329_v51 = vmul.f32 %v824_v18, %v317_v38  ;;  %v302_v44 = vmul.f32 %v819_v22, %v292_v4  ;;  %v827_v7 = vld [vmem:[%s1812_s1 + $0x190] sm:$0xff] }
  0xd3   :  { %v307_v59 = vadd.f32 %v303_v62, %v281_v49  ;;  %v327_v62 = vmul.f32 %v822_v21, %v319_v57  ;;  %v328_v18 = vmul.f32 %v823_v60, %v318_v23  ;;  %v368_v38 = vmul.f32 %v832_v9, %v969_v2 }
  0xd4   :  { %v1282_v8 = vpop.permute.xlu1 %336  ;;  %v1284_v14 = vpop.permute.xlu0 %334  ;;  %v330_v50 = vadd.f32 %v326_v20, %v304_v46  ;;  %v306_v22 = vadd.f32 %v302_v44, %v280_v25  ;;  %v839_v25 = vld [vmem:[%s1812_s1 + $0x1f0] sm:$0xff] }
  0xd5   :  { %v345_v61 = vsel %vm342_vm12, %v1284_v14, %v1282_v8 }
  0xd6   :  { %v353_v4 = vmul.f32 %v826_v56, %v345_v61  ;;  %v332_v46 = vadd.f32 %v328_v18, %v306_v22  ;;  %v838_v61 = vld [vmem:[%s1812_s1 + $0x1e8] sm:$0xff]  ;;  %v844_v18 = vld [vmem:[%s1812_s1 + $0x218] sm:$0xff] }
  0xd8   :  { %v1323_v36 = vpop.permute.xlu1 %340  ;;  %v1325_v37 = vpop.permute.xlu0 %338 }
  0xd9   :  { %v346_v58 = vsel %vm342_vm12, %v1323_v36, %v1284_v14  ;;  %v343_v16 = vsel %vm342_vm12, %v1325_v37, %v1323_v36  ;;  %v344_v43 = vsel %vm342_vm12, %v1282_v8, %v1325_v37  ;;  %v305_v14 = vadd.f32 %v301_v42, %v279_v39  ;;  %v833_v8 = vld [vmem:[%s1812_s1 + $0x1c0] sm:$0xff]  ;;  %v840_v39 = vld [vmem:[%s1812_s1 + $0x1f8] sm:$0xff] }
  0xda   :  { %v352_v36 = vmul.f32 %v825_v28, %v346_v58  ;;  %v355_v1 = vmul.f32 %v828_v24, %v343_v16  ;;  %v831_v28 = vld [vmem:[%s1812_s1 + $0x1b0] sm:$0xff]  ;;  %v333_v58 = vadd.f32 %v329_v51, %v307_v59  ;;  %v354_v20 = vmul.f32 %v827_v7, %v344_v43  ;;  %v836_v16 = vld [vmem:[%s1812_s1 + $0x1d8] sm:$0xff]  ;;  %v834_v51 = vld [vmem:[%s1812_s1 + $0x1c8] sm:$0xff] }
  0xdb   :  { %v367_v52 = vmul.f32 %v831_v28, %v957_v0  ;;  %v331_v42 = vadd.f32 %v327_v62, %v305_v14  ;;  %v837_v0 = vld [vmem:[%s1812_s1 + $0x1e0] sm:$0xff] }
  0xdc   :  { %v1376_v30 = vpop.permute.xlu1 %375  ;;  %v1378_v47 = vpop.permute.xlu0 %373  ;;  %v356_v31 = vadd.f32 %v352_v36, %v330_v50  ;;  %v359_v24 = vadd.f32 %v355_v1, %v333_v58  ;;  %v358_v15 = vadd.f32 %v354_v20, %v332_v46  ;;  %v841_v59 = vld [vmem:[%s1812_s1 + $0x200] sm:$0xff]  ;;  %v842_v58 = vld [vmem:[%s1812_s1 + $0x208] sm:$0xff] }
  0xdd   :  { %v384_v2 = vsel %vm381_vm13, %v1378_v47, %v1376_v30 }
  0xde   :  { %v369_v60 = vadd.f32 %v1381_v3, %v356_v31  ;;  %v391_v23 = vmul.f32 %v833_v8, %v384_v2  ;;  %v357_v3 = vadd.f32 %v353_v4, %v331_v42  ;;  %v372_v56 = vadd.f32 %v368_v38, %v359_v24  ;;  %v843_v4 = vld [vmem:[%s1812_s1 + $0x210] sm:$0xff]  ;;  %v845_v2 = vld [vmem:[%s1812_s1 + $0x220] sm:$0xff] }
  0xe0   :  { %v1435_v40 = vpop.permute.xlu1 %379  ;;  %v1437_v41 = vpop.permute.xlu0 %377  ;;  %v395_v28 = vadd.f32 %v391_v23, %v369_v60  ;;  %v370_v22 = vadd.f32 %v1364_v48, %v357_v3  ;;  %v853_v48 = vld [vmem:[%s1812_s1 + $0x260] sm:$0xff] }
  0xe1   :  { %v385_v21 = vsel %vm381_vm13, %v1435_v40, %v1378_v47  ;;  %v835_v47 = vld [vmem:[%s1812_s1 + $0x1d0] sm:$0xff]  ;;  %v382_v36 = vsel %vm381_vm13, %v1437_v41, %v1435_v40  ;;  %v383_v9 = vsel %vm381_vm13, %v1376_v30, %v1437_v41  ;;  %v495_v3 = vmul.f32 %v853_v48, %v1059_v19  ;;  %v850_v19 = vld [vmem:[%s1812_s1 + $0x248] sm:$0xff] }
  0xe2   :  { %v394_v30 = vmul.f32 %v836_v16, %v385_v21  ;;  %v392_v43 = vmul.f32 %v834_v51, %v383_v9  ;;  %v393_v1 = vmul.f32 %v835_v47, %v382_v36  ;;  %v848_v36 = vld [vmem:[%s1812_s1 + $0x238] sm:$0xff] }
  0xe4   :  { %v1484_v26 = vpop.permute.xlu1 %401  ;;  %v1486_v29 = vpop.permute.xlu0 %399  ;;  %v398_v24 = vadd.f32 %v394_v30, %v372_v56  ;;  %v396_v16 = vadd.f32 %v392_v43, %v370_v22  ;;  %v483_v22 = vmul.f32 %v850_v19, %v1041_v12  ;;  %v872_v19 = vld [vmem:[%s1812_s1 + $0x2f8] sm:$0xff] }
  0xe5   :  { %v410_v57 = vsel %vm407_vm14, %v1486_v29, %v1484_v26 }
  0xe6   :  { %v417_v41 = vmul.f32 %v837_v0, %v410_v57 }
  0xe8   :  { %v406_v63 = vpop.permute.xlu1 %405  ;;  %v404_v27 = vpop.permute.xlu0 %403 }
  0xe9   :  { %v411_v44 = vsel %vm407_vm14, %v406_v63, %v1486_v29  ;;  %v409_v7 = vsel %vm407_vm14, %v1484_v26, %v404_v27  ;;  %v408_v62 = vsel %vm407_vm14, %v404_v27, %v406_v63  ;;  %v371_v63 = vadd.f32 %v367_v52, %v358_v15 }
  0xea   :  { %v420_v14 = vmul.f32 %v840_v39, %v411_v44  ;;  %v418_v27 = vmul.f32 %v838_v61, %v409_v7  ;;  %v421_v52 = vadd.f32 %v417_v41, %v395_v28  ;;  %v846_v44 = vld [vmem:[%s1812_s1 + $0x228] sm:$0xff]  ;;  %v857_v7 = vld [vmem:[%s1812_s1 + $0x280] sm:$0xff] }
  0xeb   :  { %v397_v21 = vadd.f32 %v393_v1, %v371_v63  ;;  %v861_v63 = vld [vmem:[%s1812_s1 + $0x2a0] sm:$0xff] }
  0xec   :  { %v428_v37 = vpop.permute.xlu1 %427  ;;  %v426_v49 = vpop.permute.xlu0 %425  ;;  %v424_v60 = vadd.f32 %v420_v14, %v398_v24  ;;  %v422_v15 = vadd.f32 %v418_v27, %v396_v16  ;;  %v865_v24 = vld [vmem:[%s1812_s1 + $0x2c0] sm:$0xff] }
  0xed   :  { %v436_v40 = vsel %vm433_vm15, %v426_v49, %v428_v37 }
  0xee   :  { %v443_v26 = vmul.f32 %v841_v59, %v436_v40  ;;  %v847_v59 = vld [vmem:[%s1812_s1 + $0x230] sm:$0xff] }
  0xef   :  { %v851_v40 = vld [vmem:[%s1812_s1 + $0x250] sm:$0xff] }
  0xf0   :  { %v432_v50 = vpop.permute.xlu1 %431  ;;  %v430_v29 = vpop.permute.xlu0 %429  ;;  %v447_v23 = vadd.f32 %v443_v26, %v421_v52 }
  0xf1   :  { %v437_v38 = vsel %vm433_vm15, %v432_v50, %v426_v49  ;;  %v435_v31 = vsel %vm433_vm15, %v428_v37, %v430_v29  ;;  %v434_v20 = vsel %vm433_vm15, %v430_v29, %v432_v50  ;;  %v849_v37 = vld [vmem:[%s1812_s1 + $0x240] sm:$0xff]  ;;  %v419_v49 = vmul.f32 %v839_v25, %v408_v62  ;;  %v856_v62 = vld [vmem:[%s1812_s1 + $0x278] sm:$0xff] }
  0xf2   :  { %v446_v42 = vmul.f32 %v844_v18, %v437_v38  ;;  %v444_v0 = vmul.f32 %v842_v58, %v435_v31  ;;  %v445_v51 = vmul.f32 %v843_v4, %v434_v20  ;;  %v482_v9 = vmul.f32 %v849_v37, %v1043_v13  ;;  %v852_v13 = vld [vmem:[%s1812_s1 + $0x258] sm:$0xff]  ;;  %v854_v18 = vld [vmem:[%s1812_s1 + $0x268] sm:$0xff]  ;;  %v855_v38 = vld [vmem:[%s1812_s1 + $0x270] sm:$0xff] }
  0xf3   :  { %v423_v50 = vadd.f32 %v419_v49, %v397_v21  ;;  %v484_v31 = vmul.f32 %v851_v40, %v1037_v10  ;;  %v485_v5 = vmul.f32 %v852_v13, %v1039_v11  ;;  %v508_v4 = vmul.f32 %v857_v7, %v1106_v45  ;;  %v860_v20 = vld [vmem:[%s1812_s1 + $0x298] sm:$0xff]  ;;  %v859_v10 = vld [vmem:[%s1812_s1 + $0x290] sm:$0xff] }
  0xf4   :  { %v454_v8 = vpop.permute.xlu1 %453  ;;  %v452_v46 = vpop.permute.xlu0 %451  ;;  %v450_v56 = vadd.f32 %v446_v42, %v424_v60  ;;  %v448_v29 = vadd.f32 %v444_v0, %v422_v15  ;;  %v498_v37 = vmul.f32 %v856_v62, %v1085_v32  ;;  %v496_v48 = vmul.f32 %v854_v18, %v1093_v34  ;;  %v864_v42 = vld [vmem:[%s1812_s1 + $0x2b8] sm:$0xff]  ;;  %v863_v32 = vld [vmem:[%s1812_s1 + $0x2b0] sm:$0xff]  ;;  %v1866_v18 = vld [vmem:[#allocation6_spill] sm:$0xff] }
  0xf5   :  { %v462_v57 = vsel %vm459_vm0, %v452_v46, %v454_v8  ;;  %v449_v28 = vadd.f32 %v445_v51, %v423_v50  ;;  %v497_v45 = vmul.f32 %v855_v38, %v1089_v33  ;;  %v521_v49 = vmul.f32 %v861_v63, %v1141_v6  ;;  %v868_v51 = vld [vmem:[%s1812_s1 + $0x2d8] sm:$0xff]  ;;  %v1863_v40 = vld [vmem:[#allocation8_spill] sm:$0xff]  ;;  %v873_v50 = vld [vmem:[%s1812_s1 + $0x300] sm:$0xff] }
  0xf6   :  { %v469_v47 = vmul.f32 %v845_v2, %v462_v57  ;;  %v511_v21 = vmul.f32 %v860_v20, %v1122_v53  ;;  %v510_v6 = vmul.f32 %v859_v10, %v1126_v54  ;;  %v869_v57 = vld [vmem:[%s1812_s1 + $0x2e0] sm:$0xff] }
  0xf7   :  { %v547_v13 = vmul.f32 %v869_v57, %v1863_v40 }
  0xf8   :  { %v458_v39 = vpop.permute.xlu1 %457  ;;  %v473_v30 = vadd.f32 %v469_v47, %v447_v23  ;;  %v456_v61 = vpop.permute.xlu0 %455  ;;  %v534_v23 = vmul.f32 %v865_v24, %v1176_v35  ;;  %v866_v47 = vld [vmem:[%s1812_s1 + $0x2c8] sm:$0xff]  ;;  %v867_v35 = vld [vmem:[%s1812_s1 + $0x2d0] sm:$0xff]  ;;  %v1871_v24 = vld [vmem:[#allocation13_spill] sm:$0xff] }
  0xf9   :  { %v463_v41 = vsel %vm459_vm0, %v458_v39, %v452_v46  ;;  %v460_v1 = vsel %vm459_vm0, %v456_v61, %v458_v39  ;;  %v461_v25 = vsel %vm459_vm0, %v454_v8, %v456_v61  ;;  %v858_v8 = vld [vmem:[%s1812_s1 + $0x288] sm:$0xff]  ;;  %v1864_v61 = vld [vmem:[#allocation5_spill] sm:$0xff]  ;;  %v536_v38 = vmul.f32 %v867_v35, %v1866_v18 }
  0xfa   :  { %v472_v43 = vmul.f32 %v848_v36, %v463_v41  ;;  %v486_v14 = vadd.f32 %v482_v9, %v473_v30  ;;  %v470_v26 = vmul.f32 %v846_v44, %v461_v25  ;;  %v471_v58 = vmul.f32 %v847_v59, %v460_v1  ;;  %v862_v46 = vld [vmem:[%s1812_s1 + $0x2a8] sm:$0xff]  ;;  %v1860_v9 = vld [vmem:[#allocation2_spill] sm:$0xff]  ;;  %v871_v25 = vld [vmem:[%s1812_s1 + $0x2f0] sm:$0xff] }
  0xfb   :  { %v509_v0 = vmul.f32 %v858_v8, %v1130_v55  ;;  %v524_v54 = vmul.f32 %v864_v42, %v1860_v9  ;;  %v1862_v39 = vld [vmem:[#allocation3_spill] sm:$0xff]  ;;  %v537_v7 = vmul.f32 %v868_v51, %v1864_v61  ;;  %v879_v42 = vld [vmem:[%s1812_s1 + $0x330] sm:$0xff]  ;;  %v1875_v51 = vld [vmem:[#allocation17_spill] sm:$0xff]  ;;  %v1881_v18 = vmov 0.0  }
  0xfc   :  { %v476_v27 = vadd.f32 %v472_v43, %v450_v56  ;;  %v499_v11 = vadd.f32 %v495_v3, %v486_v14  ;;  %v474_v12 = vadd.f32 %v470_v26, %v448_v29  ;;  %v475_v2 = vadd.f32 %v471_v58, %v449_v28  ;;  %v1861_v3 = vld [vmem:[#allocation4_spill] sm:$0xff]  ;;  %v1865_v29 = vld [vmem:[#allocation7_spill] sm:$0xff]  ;;  %v876_v28 = vld [vmem:[%s1812_s1 + $0x318] sm:$0xff] }
  0xfd   :  { %v522_v15 = vmul.f32 %v862_v46, %v1861_v3  ;;  %v523_v44 = vmul.f32 %v863_v32, %v1862_v39  ;;  %v535_v43 = vmul.f32 %v866_v47, %v1865_v29  ;;  %v870_v1 = vld [vmem:[%s1812_s1 + $0x2e8] sm:$0xff]  ;;  %v1876_v9 = vld [vmem:[#allocation18_spill] sm:$0xff]  ;;  %v575_v3 = vmul.f32 %v879_v42, %v1350_v17 }
  0xfe   :  { %v489_v52 = vadd.f32 %v485_v5, %v476_v27  ;;  %v512_v33 = vadd.f32 %v508_v4, %v499_v11  ;;  %v487_v34 = vadd.f32 %v483_v22, %v474_v12  ;;  %v488_v16 = vadd.f32 %v484_v31, %v475_v2  ;;  %v1867_v31 = vld [vmem:[#allocation9_spill] sm:$0xff]  ;;  %v1868_v22 = vld [vmem:[#allocation12_spill] sm:$0xff]  ;;  %v874_v27 = vld [vmem:[%s1812_s1 + $0x308] sm:$0xff] }
  0xff   :  { %v550_v5 = vmul.f32 %v872_v19, %v1867_v31  ;;  %v560_v63 = vmul.f32 %v873_v50, %v1868_v22  ;;  %v875_v4 = vld [vmem:[%s1812_s1 + $0x310] sm:$0xff]  ;;  %v1869_v8 = vld [vmem:[#allocation11_spill] sm:$0xff]  ;;  %v1870_v11 = vld [vmem:[#allocation10_spill] sm:$0xff] }
 0x100   :  { %v502_v60 = vadd.f32 %v498_v37, %v489_v52  ;;  %v500_v53 = vadd.f32 %v496_v48, %v487_v34  ;;  %v501_v36 = vadd.f32 %v497_v45, %v488_v16  ;;  %v525_v55 = vadd.f32 %v521_v49, %v512_v33  ;;  %v877_v2 = vld [vmem:[%s1812_s1 + $0x320] sm:$0xff]  ;;  %v880_v37 = vld [vmem:[%s1812_s1 + $0x338] sm:$0xff]  ;;  %v878_v49 = vld [vmem:[%s1812_s1 + $0x328] sm:$0xff] }
 0x101   :  { %v548_v10 = vmul.f32 %v870_v1, %v1869_v8  ;;  %v549_v12 = vmul.f32 %v871_v25, %v1870_v11  ;;  %v563_v52 = vmul.f32 %v876_v28, %v1871_v24  ;;  %v1872_v33 = vld [vmem:[#allocation14_spill] sm:$0xff]  ;;  %v1873_v16 = vld [vmem:[#allocation15_spill] sm:$0xff]  ;;  %v576_v47 = vmul.f32 %v880_v37, %v1875_v51  ;;  %v1878_v19 = vld [vmem:[#allocation20_spill] sm:$0xff] }
 0x102   :  { %v515_v59 = vadd.f32 %v511_v21, %v502_v60  ;;  %v513_v56 = vadd.f32 %v509_v0, %v500_v53  ;;  %v514_v30 = vadd.f32 %v510_v6, %v501_v36  ;;  %v538_v41 = vadd.f32 %v534_v23, %v525_v55  ;;  %v884_v6 = vld [vmem:[%s1812_s1 + $0x358] sm:$0xff]  ;;  %v1874_v60 = vld [vmem:[#allocation16_spill] sm:$0xff]  ;;  %v882_v36 = vld [vmem:[%s1812_s1 + $0x348] sm:$0xff] }
 0x103   :  { %v561_v34 = vmul.f32 %v874_v27, %v1872_v33  ;;  %v562_v21 = vmul.f32 %v875_v4, %v1873_v16  ;;  %v573_v23 = vmul.f32 %v877_v2, %v1874_v60  ;;  %v883_v53 = vld [vmem:[%s1812_s1 + $0x350] sm:$0xff]  ;;  %v594_v25 = vld [vmem:[%s1814_s2] sm:$0xff] }
 0x104   :  { %v528_v62 = vadd.f32 %v524_v54, %v515_v59  ;;  %v526_v14 = vadd.f32 %v522_v15, %v513_v56  ;;  %v551_v26 = vadd.f32 %v547_v13, %v538_v41  ;;  %v527_v58 = vadd.f32 %v523_v44, %v514_v30  ;;  %v881_v15 = vld [vmem:[%s1812_s1 + $0x340] sm:$0xff]  ;;  %v1877_v59 = vld [vmem:[#allocation19_spill] sm:$0xff] }
 0x105   :  { %v574_v54 = vmul.f32 %v878_v49, %v1876_v9  ;;  %v589_v40 = vmul.f32 %v884_v6, %v1877_v59  ;;  %v588_v50 = vmul.f32 %v883_v53, %v1878_v19  ;;  %v1879_v30 = vld [vmem:[#allocation22_spill] sm:$0xff] }
 0x106   :  { %v541_v20 = vadd.f32 %v537_v7, %v528_v62  ;;  %v539_v48 = vadd.f32 %v535_v43, %v526_v14  ;;  %v540_v45 = vadd.f32 %v536_v38, %v527_v58  ;;  %v564_v32 = vadd.f32 %v560_v63, %v551_v26  ;;  %v1880_v7 = vld [vmem:[#allocation21_spill] sm:$0xff]  ;;  %v595_v38 = vld [vmem:[%s1814_s2 + $0x8] sm:$0xff] }
 0x107   :  { %v587_v41 = vmul.f32 %v882_v36, %v1879_v30  ;;  %v586_v29 = vmul.f32 %v881_v15, %v1880_v7 }
 0x108   :  { %v554_v46 = vadd.f32 %v550_v5, %v541_v20  ;;  %v552_v0 = vadd.f32 %v548_v10, %v539_v48  ;;  %v553_v57 = vadd.f32 %v549_v12, %v540_v45  ;;  %v577_v13 = vadd.f32 %v573_v23, %v564_v32 }
 0x10a   :  { %v567_v55 = vadd.f32 %v563_v52, %v554_v46  ;;  %v565_v39 = vadd.f32 %v561_v34, %v552_v0  ;;  %v566_v44 = vadd.f32 %v562_v21, %v553_v57  ;;  %v590_v62 = vadd.f32 %v586_v29, %v577_v13  ;;  %v601_v28 = vpop.permute.xlu0 %600  ;;  %v606_v27 = vpop.permute.xlu1 %605 }
 0x10c   :  { %v580_v35 = vadd.f32 %v576_v47, %v567_v55  ;;  %v578_v56 = vadd.f32 %v574_v54, %v565_v39  ;;  %v579_v61 = vadd.f32 %v575_v3, %v566_v44 }
 0x10e   :  { %v593_v43 = vadd.f32 %v589_v40, %v580_v35  ;;  %v591_v17 = vadd.f32 %v587_v41, %v578_v56  ;;  %v592_v1 = vadd.f32 %v588_v50, %v579_v61 }
 0x110   :  { %692 = vmatprep.subr.mxu1 %v593_v43  ;;  %615 = vmatprep.subr.mxu0 %v591_v17 }
 0x111   :  { %693 = vmatpush1.msra.mxu1 %v592_v1  ;;  %616 = vmatpush1.msra.mxu0 %v590_v62 }
 0x112   :  { %887 = vmatmul.mubr.msk.f32.vlgmr.msra.gmra.mrb[0].mxu1 %vm608_vm1, %v594_v25  ;;  %885 = vmatmul.mubr.msk.f32.vlgmr.msra.gmra.mrb[0].mxu0 %vm608_vm1, %v594_v25 }
 0x113   :  { %762 = vmatprep.mubr.f32.mxu1 %v1881_v18  ;;  %685 = vmatprep.mubr.f32.mxu0 %v1881_v18 }
 0x116   :  { %888 = vmatmul.mubr.msk.f32.gmra.mrb[2].mxu1 %vm608_vm1, %v595_v38  ;;  %886 = vmatmul.mubr.msk.f32.gmra.mrb[2].mxu0 %vm608_vm1, %v595_v38 }
 0x1e5   :  { %v758_v14 = vpop.f32.mrb[0].mxu1  ;;  %v681_v58 = vpop.f32.mrb[0].mxu0 }
 0x1e6   :  { %v759_v26 = vadd.f32 %v758_v14, %v601_v28  ;;  %v760_v31 = vpop.f32.mrb[1].mxu1  ;;  %v682_v5 = vadd.f32 %v681_v58, %v601_v28  ;;  %v683_v22 = vpop.f32.mrb[1].mxu0 }
 0x1e7   :  { %v761_v63 = vadd.f32 %v760_v31, %v601_v28  ;;  %v684_v4 = vadd.f32 %v683_v22, %v601_v28 }
 0x1e8   :  { %771 = vst [vmem:[%s1815_s4 + $0x10] sm:$0xff] %v759_v26  ;;  %769 = vst [vmem:[%s1815_s4] sm:$0xff] %v682_v5 }
 0x1e9   :  { %772 = vst [vmem:[%s1815_s4 + $0x18] sm:$0xff] %v761_v63  ;;  %v764_v20 = vpop.f32.mrb[2].mxu1  ;;  %770 = vst [vmem:[%s1815_s4 + $0x8] sm:$0xff] %v684_v4  ;;  %v687_v8 = vpop.f32.mrb[2].mxu0 }
 0x1ea   :  { %v765_v10 = vadd.f32 %v764_v20, %v606_v27  ;;  %v766_v11 = vpop.f32.mrb[3].mxu1  ;;  %v688_v12 = vadd.f32 %v687_v8, %v606_v27  ;;  %v689_v2 = vpop.f32.mrb[3].mxu0 }
 0x1eb   :  { %v767_v37 = vadd.f32 %v766_v11, %v606_v27  ;;  %v690_v48 = vadd.f32 %v689_v2, %v606_v27 }
 0x1ec   :  { %775 = vst [vmem:[%s1815_s4 + $0x30] sm:$0xff] %v765_v10  ;;  %773 = vst [vmem:[%s1815_s4 + $0x20] sm:$0xff] %v688_v12 }
 0x1ed   :  { %776 = vst [vmem:[%s1815_s4 + $0x38] sm:$0xff] %v767_v37  ;;  %774 = vst [vmem:[%s1815_s4 + $0x28] sm:$0xff] %v690_v48 }

</bundles_post_ra>
